<compile_context>
chip_gen: v5e
topology: v5e:2x2
jax: 0.10.0
libtpu: 0.0.40
codegen_flags: <defaults>
</compile_context>

<pallas_src>
import functools

import jax
import jax.numpy as jnp
from jax.experimental import pallas as pl
from jax.experimental.pallas import tpu as pltpu


def _round_up(n, m):
    return ((n + m - 1) // m) * m


def _mlp_kernel(depth, xt_ref, *refs):
    """Fused transposed MLP.

    refs layout (all VMEM):
      xt_ref                      (D, TB)  bf16   x tile, transposed (lanes = batch)
      [w_ref, shift_ref] x depth  (H, in) bf16 / (H, 1) f32   BN-folded Linear
      wf_ref, bf_ref              (1, H) bf16 / (1, 1) f32    final Linear -> 1
      out_ref                     (1, TB) f32    lane-dense output tile
    """
    out_ref = refs[-1]
    p = refs[:-1]

    h = xt_ref[...]  # (D, TB) bf16
    for i in range(depth):
        w = p[2 * i][...]          # (H, in) bf16 (BN scale folded in)
        shift = p[2 * i + 1][...]  # (H, 1)  f32  (bias + BN shift folded)
        z = jnp.dot(w, h, preferred_element_type=jnp.float32)  # MXU, f32 acc
        h = jnp.maximum(z + shift, 0.0).astype(jnp.bfloat16)   # VPU in f32, store bf16
        # Dropout: identity in eval mode.

    wf = p[2 * depth][...]      # (1, H) bf16
    bf = p[2 * depth + 1][...]  # (1, 1) f32
    out_ref[...] = jnp.dot(wf, h, preferred_element_type=jnp.float32) + bf


def airbnb_price_model_forward(x, kernel_params, depth, *, max_tile=2048):
    """x: (batch, input_dim) f32. kernel_params: [w0, sh0, ..., wf, bf] (see pack_kernel_params)."""
    batch, in_dim = x.shape

    # Batch tile: large (>=2048 rows) for real batches, lane-aligned (mult of 128) always.
    tb = max_tile if batch >= max_tile else _round_up(max(batch, 1), 128)
    b_pad = _round_up(batch, tb)
    grid = b_pad // tb

    # Transposed, bf16, zero-padded input: (D, B_pad). bf16 halves the binding HBM traffic.
    xt = x.astype(jnp.bfloat16).T
    if b_pad != batch:
        xt = jnp.pad(xt, ((0, 0), (0, b_pad - batch)))

    kernel = functools.partial(_mlp_kernel, depth)

    # x tile marches along the batch axis; params have constant block index -> stay resident.
    xt_spec = pl.BlockSpec((in_dim, tb), lambda i: (0, i))
    param_specs = [pl.BlockSpec(p.shape, lambda i: (0, 0)) for p in kernel_params]
    out_spec = pl.BlockSpec((1, tb), lambda i: (0, i))  # lane-dense output stores

    out = pl.pallas_call(
        kernel,
        out_shape=jax.ShapeDtypeStruct((1, b_pad), jnp.float32),
        grid=(grid,),
        in_specs=[xt_spec] + param_specs,
        out_specs=out_spec,
        compiler_params=pltpu.CompilerParams(dimension_semantics=("parallel",)),
    )(xt, *kernel_params)

    return out[0, :batch].reshape(batch, 1)


def init_params(key, input_dim, hidden_layer_width, depth):
    """PyTorch-default-style init (uniform +-1/sqrt(fan_in)), with BatchNorm1d folded
    using its eval/init statistics (gamma=1, beta=0, mean=0, var=1).
    Returns f32 per-layer tuples: [(w_folded (out,in), shift (out,)), ..., (wf (1,H), bf (1,))]."""
    eps = 1e-5
    layers = []
    in_dim = input_dim
    for _ in range(depth):
        key, kw, kb = jax.random.split(key, 3)
        bound = 1.0 / jnp.sqrt(jnp.float32(in_dim))
        w = jax.random.uniform(kw, (hidden_layer_width, in_dim), jnp.float32, -bound, bound)
        b = jax.random.uniform(kb, (hidden_layer_width,), jnp.float32, -bound, bound)
        gamma = jnp.ones((hidden_layer_width,), jnp.float32)
        beta = jnp.zeros((hidden_layer_width,), jnp.float32)
        mean = jnp.zeros((hidden_layer_width,), jnp.float32)
        var = jnp.ones((hidden_layer_width,), jnp.float32)
        scale = gamma / jnp.sqrt(var + eps)
        w_folded = w * scale[:, None]          # x @ W^T * s == x @ (s * W)^T
        shift = (b - mean) * scale + beta
        layers.append((w_folded, shift))
        in_dim = hidden_layer_width
    key, kw, kb = jax.random.split(key, 3)
    bound = 1.0 / jnp.sqrt(jnp.float32(hidden_layer_width))
    wf = jax.random.uniform(kw, (1, hidden_layer_width), jnp.float32, -bound, bound)
    bf = jax.random.uniform(kb, (1,), jnp.float32, -bound, bound)
    layers.append((wf, bf))
    return layers


def pack_kernel_params(layers):
    """Flat kernel param list: bf16 weights (out,in), f32 shifts (out,1), bf16 wf (1,H), f32 bf (1,1)."""
    params = []
    for w, sh in layers[:-1]:
        params.append(w.astype(jnp.bfloat16))
        params.append(sh.reshape(-1, 1).astype(jnp.float32))
    wf, bf = layers[-1]
    params.append(wf.astype(jnp.bfloat16))
    params.append(bf.reshape(1, 1).astype(jnp.float32))
    return params


def reference_forward_f32(x, layers):
    """Full-precision reference matching PyTorch eval() forward."""
    h = x
    for w, sh in layers[:-1]:
        h = jnp.maximum(h @ w.T + sh, 0.0)
    wf, bf = layers[-1]
    return h @ wf.T + bf


def reference_forward_bf16(x, kernel_params, depth):
    """Pure-JAX replica of the kernel's exact (transposed, bf16-fed, f32-accumulated) math."""
    h = x.astype(jnp.bfloat16).T  # (D, B)
    for i in range(depth):
        w = kernel_params[2 * i]
        sh = kernel_params[2 * i + 1]
        z = jnp.dot(w, h, preferred_element_type=jnp.float32)
        h = jnp.maximum(z + sh, 0.0).astype(jnp.bfloat16)
    wf = kernel_params[2 * depth]
    bf = kernel_params[2 * depth + 1]
    out = jnp.dot(wf, h, preferred_element_type=jnp.float32) + bf  # (1, B)
    return out.T  # (B, 1)


if __name__ == "__main__":
    # Small shapes consistent with the module.
    batch = 8
    input_dim = 16
    config = {"hidden_layer_width": 32, "depth": 3, "dropout_prob": 0.1}
    hidden = config["hidden_layer_width"]
    depth = config["depth"]

    key = jax.random.PRNGKey(0)
    key, kx = jax.random.split(key)
    x = jax.random.normal(kx, (batch, input_dim), jnp.float32)

    layers = init_params(key, input_dim, hidden, depth)
    kernel_params = pack_kernel_params(layers)

    out = airbnb_price_model_forward(x, kernel_params, depth)
    out = jax.block_until_ready(out)
    assert out.shape == (batch, 1)

    # 1) Exact-math check vs a pure-JAX replica of the kernel's bf16/f32 computation.
    ref_bf16 = reference_forward_bf16(x, kernel_params, depth)
    assert jnp.allclose(out, ref_bf16, atol=1e-4, rtol=1e-4), "mismatch vs bf16 reference"

    # 2) Semantics check vs full-f32 PyTorch eval() math (loose tolerance due to bf16 inputs/weights).
    ref_f32 = reference_forward_f32(x, layers)
    assert jnp.allclose(out, ref_f32, atol=3e-2, rtol=3e-2), "mismatch vs f32 reference"

    print("KERNEL_OK")
</pallas_src>

<mosaic_0001>
module attributes {stable_mosaic.version = 11 : i64} {
  func.func @_mlp_kernel(%arg0: i32, %arg1: memref<16x128xbf16, #tpu.memory_space<vmem>>, %arg2: memref<32x16xbf16, #tpu.memory_space<vmem>>, %arg3: memref<32x1xf32, #tpu.memory_space<vmem>>, %arg4: memref<32x32xbf16, #tpu.memory_space<vmem>>, %arg5: memref<32x1xf32, #tpu.memory_space<vmem>>, %arg6: memref<32x32xbf16, #tpu.memory_space<vmem>>, %arg7: memref<32x1xf32, #tpu.memory_space<vmem>>, %arg8: memref<1x32xbf16, #tpu.memory_space<vmem>>, %arg9: memref<1x1xf32, #tpu.memory_space<vmem>>, %arg10: memref<1x128xf32, #tpu.memory_space<vmem>>) attributes {dimension_semantics = [#tpu.dimension_semantics<parallel>], iteration_bounds = array<i64: 1>, scalar_prefetch = 0 : i64, scratch_operands = 0 : i64, tpu.core_type = #tpu.core_type<tc>, window_params = [{transform_indices = @transform_0, window_bounds = array<i64: 16, 128>}, {pipeline_mode = #tpu.pipeline_mode<synchronous>, transform_indices = @transform_1, window_bounds = array<i64: 32, 16>}, {pipeline_mode = #tpu.pipeline_mode<synchronous>, transform_indices = @transform_2, window_bounds = array<i64: 32, 1>}, {pipeline_mode = #tpu.pipeline_mode<synchronous>, transform_indices = @transform_3, window_bounds = array<i64: 32, 32>}, {pipeline_mode = #tpu.pipeline_mode<synchronous>, transform_indices = @transform_4, window_bounds = array<i64: 32, 1>}, {pipeline_mode = #tpu.pipeline_mode<synchronous>, transform_indices = @transform_5, window_bounds = array<i64: 32, 32>}, {pipeline_mode = #tpu.pipeline_mode<synchronous>, transform_indices = @transform_6, window_bounds = array<i64: 32, 1>}, {pipeline_mode = #tpu.pipeline_mode<synchronous>, transform_indices = @transform_7, window_bounds = array<i64: 1, 32>}, {pipeline_mode = #tpu.pipeline_mode<synchronous>, transform_indices = @transform_8, window_bounds = array<i64: 1, 1>}, {transform_indices = @transform_9, window_bounds = array<i64: 1, 128>}]} {
    %c0 = arith.constant 0 : index
    %c0_0 = arith.constant 0 : index
    %0 = vector.load %arg1[%c0, %c0_0] : memref<16x128xbf16, #tpu.memory_space<vmem>>, vector<16x128xbf16>
    %c0_1 = arith.constant 0 : index
    %c0_2 = arith.constant 0 : index
    %1 = vector.load %arg2[%c0_1, %c0_2] : memref<32x16xbf16, #tpu.memory_space<vmem>>, vector<32x16xbf16>
    %c0_3 = arith.constant 0 : index
    %c0_4 = arith.constant 0 : index
    %2 = vector.load %arg3[%c0_3, %c0_4] : memref<32x1xf32, #tpu.memory_space<vmem>>, vector<32x1xf32>
    %cst = arith.constant dense<0.000000e+00> : vector<32x128xf32>
    %3 = tpu.matmul %1, %0, %cst {dimension_numbers = #tpu.dot_dimension_numbers<[1], [0], [0], [1], [0, 0, 1, 1], [], []>} : vector<32x16xbf16>, vector<16x128xbf16>, vector<32x128xf32> -> vector<32x128xf32>
    %4 = vector.broadcast %2 : vector<32x1xf32> to vector<32x128xf32>
    %5 = arith.addf %3, %4 : vector<32x128xf32>
    %cst_5 = arith.constant 0.000000e+00 : f32
    %6 = vector.broadcast %cst_5 : f32 to vector<32x128xf32>
    %7 = arith.maximumf %5, %6 : vector<32x128xf32>
    %8 = arith.truncf %7 : vector<32x128xf32> to vector<32x128xbf16>
    %c0_6 = arith.constant 0 : index
    %c0_7 = arith.constant 0 : index
    %9 = vector.load %arg4[%c0_6, %c0_7] : memref<32x32xbf16, #tpu.memory_space<vmem>>, vector<32x32xbf16>
    %c0_8 = arith.constant 0 : index
    %c0_9 = arith.constant 0 : index
    %10 = vector.load %arg5[%c0_8, %c0_9] : memref<32x1xf32, #tpu.memory_space<vmem>>, vector<32x1xf32>
    %cst_10 = arith.constant dense<0.000000e+00> : vector<32x128xf32>
    %11 = tpu.matmul %9, %8, %cst_10 {dimension_numbers = #tpu.dot_dimension_numbers<[1], [0], [0], [1], [0, 0, 1, 1], [], []>} : vector<32x32xbf16>, vector<32x128xbf16>, vector<32x128xf32> -> vector<32x128xf32>
    %12 = vector.broadcast %10 : vector<32x1xf32> to vector<32x128xf32>
    %13 = arith.addf %11, %12 : vector<32x128xf32>
    %cst_11 = arith.constant 0.000000e+00 : f32
    %14 = vector.broadcast %cst_11 : f32 to vector<32x128xf32>
    %15 = arith.maximumf %13, %14 : vector<32x128xf32>
    %16 = arith.truncf %15 : vector<32x128xf32> to vector<32x128xbf16>
    %c0_12 = arith.constant 0 : index
    %c0_13 = arith.constant 0 : index
    %17 = vector.load %arg6[%c0_12, %c0_13] : memref<32x32xbf16, #tpu.memory_space<vmem>>, vector<32x32xbf16>
    %c0_14 = arith.constant 0 : index
    %c0_15 = arith.constant 0 : index
    %18 = vector.load %arg7[%c0_14, %c0_15] : memref<32x1xf32, #tpu.memory_space<vmem>>, vector<32x1xf32>
    %cst_16 = arith.constant dense<0.000000e+00> : vector<32x128xf32>
    %19 = tpu.matmul %17, %16, %cst_16 {dimension_numbers = #tpu.dot_dimension_numbers<[1], [0], [0], [1], [0, 0, 1, 1], [], []>} : vector<32x32xbf16>, vector<32x128xbf16>, vector<32x128xf32> -> vector<32x128xf32>
    %20 = vector.broadcast %18 : vector<32x1xf32> to vector<32x128xf32>
    %21 = arith.addf %19, %20 : vector<32x128xf32>
    %cst_17 = arith.constant 0.000000e+00 : f32
    %22 = vector.broadcast %cst_17 : f32 to vector<32x128xf32>
    %23 = arith.maximumf %21, %22 : vector<32x128xf32>
    %24 = arith.truncf %23 : vector<32x128xf32> to vector<32x128xbf16>
    %c0_18 = arith.constant 0 : index
    %c0_19 = arith.constant 0 : index
    %25 = vector.load %arg8[%c0_18, %c0_19] : memref<1x32xbf16, #tpu.memory_space<vmem>>, vector<1x32xbf16>
    %c0_20 = arith.constant 0 : index
    %c0_21 = arith.constant 0 : index
    %26 = vector.load %arg9[%c0_20, %c0_21] : memref<1x1xf32, #tpu.memory_space<vmem>>, vector<1x1xf32>
    %cst_22 = arith.constant dense<0.000000e+00> : vector<1x128xf32>
    %27 = tpu.matmul %25, %24, %cst_22 {dimension_numbers = #tpu.dot_dimension_numbers<[1], [0], [0], [1], [0, 0, 1, 1], [], []>} : vector<1x32xbf16>, vector<32x128xbf16>, vector<1x128xf32> -> vector<1x128xf32>
    %28 = vector.broadcast %26 : vector<1x1xf32> to vector<1x128xf32>
    %29 = arith.addf %27, %28 : vector<1x128xf32>
    %c0_23 = arith.constant 0 : index
    %c0_24 = arith.constant 0 : index
    %30 = vector.load %arg10[%c0_23, %c0_24] : memref<1x128xf32, #tpu.memory_space<vmem>>, vector<1x128xf32>
    tpu.vector_store %arg10[%c0_23, %c0_24], %29 {strides = array<i32>} : memref<1x128xf32, #tpu.memory_space<vmem>>, vector<1x128xf32>,
    return
  }
  func.func @transform_0(%arg0: i32) -> (i32, i32) {
    %c0_i32 = arith.constant 0 : i32
    %c0_i32_0 = arith.constant 0 : i32
    return %c0_i32, %arg0 : i32, i32
  }
  func.func @transform_1(%arg0: i32) -> (i32, i32) {
    %c0_i32 = arith.constant 0 : i32
    %c0_i32_0 = arith.constant 0 : i32
    %c0_i32_1 = arith.constant 0 : i32
    return %c0_i32, %c0_i32_0 : i32, i32
  }
  func.func @transform_2(%arg0: i32) -> (i32, i32) {
    %c0_i32 = arith.constant 0 : i32
    %c0_i32_0 = arith.constant 0 : i32
    %c0_i32_1 = arith.constant 0 : i32
    return %c0_i32, %c0_i32_0 : i32, i32
  }
  func.func @transform_3(%arg0: i32) -> (i32, i32) {
    %c0_i32 = arith.constant 0 : i32
    %c0_i32_0 = arith.constant 0 : i32
    %c0_i32_1 = arith.constant 0 : i32
    return %c0_i32, %c0_i32_0 : i32, i32
  }
  func.func @transform_4(%arg0: i32) -> (i32, i32) {
    %c0_i32 = arith.constant 0 : i32
    %c0_i32_0 = arith.constant 0 : i32
    %c0_i32_1 = arith.constant 0 : i32
    return %c0_i32, %c0_i32_0 : i32, i32
  }
  func.func @transform_5(%arg0: i32) -> (i32, i32) {
    %c0_i32 = arith.constant 0 : i32
    %c0_i32_0 = arith.constant 0 : i32
    %c0_i32_1 = arith.constant 0 : i32
    return %c0_i32, %c0_i32_0 : i32, i32
  }
  func.func @transform_6(%arg0: i32) -> (i32, i32) {
    %c0_i32 = arith.constant 0 : i32
    %c0_i32_0 = arith.constant 0 : i32
    %c0_i32_1 = arith.constant 0 : i32
    return %c0_i32, %c0_i32_0 : i32, i32
  }
  func.func @transform_7(%arg0: i32) -> (i32, i32) {
    %c0_i32 = arith.constant 0 : i32
    %c0_i32_0 = arith.constant 0 : i32
    %c0_i32_1 = arith.constant 0 : i32
    return %c0_i32, %c0_i32_0 : i32, i32
  }
  func.func @transform_8(%arg0: i32) -> (i32, i32) {
    %c0_i32 = arith.constant 0 : i32
    %c0_i32_0 = arith.constant 0 : i32
    %c0_i32_1 = arith.constant 0 : i32
    return %c0_i32, %c0_i32_0 : i32, i32
  }
  func.func @transform_9(%arg0: i32) -> (i32, i32) {
    %c0_i32 = arith.constant 0 : i32
    %c0_i32_0 = arith.constant 0 : i32
    return %c0_i32, %arg0 : i32, i32
  }
}

</mosaic_0001>

<bundles_post_ra>
// kernel: tpu_custom_call.1
= control target key start
LH: loop header
LB: loop body
LE: loop exit
PB: predicated region body
PF: predicated region fallthrough
CT: control target
= control target key end

     0   :  { %s490_s0 = inlined_call_operand.vmem [shape: bf16[16,128], index: 0, kind: input, shape index: {}]   ;;  %s491_s1 = inlined_call_operand.vmem [shape: bf16[32,16], index: 1, kind: input, shape index: {}]   ;;  %s492_s2 = inlined_call_operand.vmem [shape: f32[32,1], index: 2, kind: input, shape index: {}]   ;;  %s493_s3 = inlined_call_operand.vmem [shape: bf16[32,32], index: 3, kind: input, shape index: {}]   ;;  %s494_s4 = inlined_call_operand.vmem [shape: f32[32,1], index: 4, kind: input, shape index: {}]   ;;  %s495_s5 = inlined_call_operand.vmem [shape: bf16[32,32], index: 5, kind: input, shape index: {}]   ;;  %s496_s6 = inlined_call_operand.vmem [shape: f32[32,1], index: 6, kind: input, shape index: {}]   ;;  %s497_s7 = inlined_call_operand.vmem [shape: bf16[1,32], index: 7, kind: input, shape index: {}]   ;;  %s498_s8 = inlined_call_operand.<no memory space> [shape: f32[1,1], index: 8, kind: input, shape index: {}]   ;;  %s499_s9 = inlined_call_operand.hbm [shape: f32[1,128], index: 9, kind: output, shape index: {}]  }
   0x1   :  { %v14_v0 = vstv %s498_s8 }
   0x2   :  { %15 = vst [vmem:[#allocation2] sm:$0x1] %v14_v0 }
   0x3   :  { %v44_v1 = vld [vmem:[%s492_s2 + $0x10] sm:$0xff]  ;;  %v329_v2 = vld [vmem:[%s490_s0] sm:$0xff]  ;;  %v367_v3 = vmov 0   ;;  %vm82_vm0 = vcmask 130048  }
   0x4   :  { %338 = vset.pattern.permute.xlu0 %v367_v3  ;;  %v330_v4 = vld [vmem:[%s491_s1] sm:$0xff]  ;;  %339 = vset.pattern.permute.xlu1 %v367_v3 }
   0x5   :  { %v42_v5 = vld [vmem:[%s492_s2] sm:$0xff]  ;;  %58 = vperm.xlu0 %338, %v44_v1   ;;  %96 = vmatpush.bf16.msra.mxu0 %v329_v2 }
   0x6   :  { %48 = vperm.xlu1 %339, %v42_v5   ;;  %340 = vset.pattern.permute.xlu2 %v367_v3 }
   0x7   :  { %16 = vsyncpa [#allocation4], 0  ;;  %v45_v6 = vld [vmem:[%s492_s2 + $0x18] sm:$0xff]  ;;  %v43_v7 = vld [vmem:[%s492_s2 + $0x8] sm:$0xff]  ;;  %vm152_vm1 = vcmask 261120   ;;  %s368_s20 = smov [#allocation3]  }
   0x8   :  { %306 = vmatmul.msk.bf16.vlgmr.msra.gmra.mxu0 %vm82_vm0, %v330_v4  ;;  %v118_v8 = vld [vmem:[%s494_s4] sm:$0xff]  ;;  %v119_v9 = vld [vmem:[%s494_s4 + $0x8] sm:$0xff]  ;;  %v191_v11 = vld [vmem:[%s496_s6 + $0x18] sm:$0xff]  ;;  %s283_s21 = sshll.u32 %s368_s20, 4  ;;  %s285_s24 = sshll.u32 %s499_s9, 4  ;;  %s284_s21 = int_to_ptr.vmem [resolvable:$true] %s283_s21  ;;  %s286_s24 = int_to_ptr.hbm [resolvable:$true] %s285_s24 }
   0x9   :  { %v331_v10 = vld [vmem:[%s491_s1 + $0x8] sm:$0xff]  ;;  %v188_v12 = vld [vmem:[%s496_s6] sm:$0xff]  ;;  %v120_v19 = vld [vmem:[%s494_s4 + $0x10] sm:$0xff] }
   0xa   :  { %v254_v13 = vld [vmem:[#allocation2] sm:$0x1]  ;;  %134 = vperm.xlu2 %340, %v120_v19   ;;  %v121_v29 = vld [vmem:[%s494_s4 + $0x18] sm:$0xff]  ;;  %v190_v35 = vld [vmem:[%s496_s6 + $0x10] sm:$0xff] }
   0xb   :  { %v332_v34 = vld [vmem:[%s493_s3] sm:$0xff]  ;;  %v189_v36 = vld [vmem:[%s496_s6 + $0x8] sm:$0xff] }
   0xc   :  { %v333_v37 = vld [vmem:[%s493_s3 + $0x8] sm:$0xff]  ;;  %v334_v56 = vld [vmem:[%s495_s5] sm:$0xff] }
   0xd   :  { %63 = vperm.xlu0 %338, %v45_v6   ;;  %v335_v57 = vld [vmem:[%s495_s5 + $0x8] sm:$0xff] }
   0xe   :  { %53 = vperm.xlu1 %339, %v43_v7  }
  0x12   :  { %139 = vperm.xlu2 %340, %v121_v29  }
  0x15   :  { %124 = vperm.xlu0 %338, %v118_v8  }
  0x16   :  { %129 = vperm.xlu1 %339, %v119_v9  }
  0x18   :  { %307 = vmatmul.msk.bf16.gmra.mxu0 %vm82_vm0, %v331_v10 }
  0x1a   :  { %204 = vperm.xlu2 %340, %v190_v35  }
  0x1d   :  { %209 = vperm.xlu0 %338, %v191_v11  }
  0x1e   :  { %194 = vperm.xlu1 %339, %v188_v12   ;;  %v253_v12 = vld [vmem:[%s497_s7] sm:$0x1] }
  0x22   :  { %199 = vperm.xlu2 %340, %v189_v36  }
  0x25   :  { %257 = vperm.xlu0 %338, %v254_v13  }
  0x64   :  { %v135_v40 = vpop.permute.xlu2 %134 }
  0x6c   :  { %v140_v44 = vpop.permute.xlu2 %139 }
  0x74   :  { %v205_v60 = vpop.permute.xlu2 %204 }
  0x77   :  { %v59_v16 = vpop.permute.xlu0 %58 }
  0x78   :  { %v49_v17 = vpop.permute.xlu1 %48 }
  0x7c   :  { %v200_v0 = vpop.permute.xlu2 %199 }
  0x7f   :  { %v64_v20 = vpop.permute.xlu0 %63 }
  0x80   :  { %v54_v22 = vpop.permute.xlu1 %53 }
  0x85   :  { %v98_v14 = vpop.f32.mrf.mxu0 }
  0x86   :  { %v99_v26 = vadd.f32 %v98_v14, %v49_v17 }
  0x87   :  { %v125_v48 = vpop.permute.xlu0 %124 }
  0x88   :  { %v108_v32 = vmax.f32 %v99_v26, 0.0  ;;  %v130_v42 = vpop.permute.xlu1 %129 }
  0x8d   :  { %v100_v15 = vpop.f32.mrf.mxu0 }
  0x8e   :  { %v101_v24 = vadd.f32 %v100_v15, %v54_v22 }
  0x8f   :  { %v210_v62 = vpop.permute.xlu0 %209 }
  0x90   :  { %v109_v30 = vmax.f32 %v101_v24, 0.0  ;;  %v195_v4 = vpop.permute.xlu1 %194 }
  0x92   :  { %v112_v33 = vpack.c.bf16 %v109_v30, %v108_v32 }
  0x95   :  { %v103_v18 = vpop.f32.mrf.mxu0 }
  0x96   :  { %v104_v21 = vadd.f32 %v103_v18, %v59_v16 }
  0x97   :  { %v258_v13 = vpop.permute.xlu0 %257 }
  0x98   :  { %v110_v27 = vmax.f32 %v104_v21, 0.0  ;;  %v260_v14 = vperm.slane %v258_v13, 0 }
  0x9d   :  { %v105_v23 = vpop.f32.mrf.mxu0 }
  0x9e   :  { %v106_v25 = vadd.f32 %v105_v23, %v64_v20 }
  0xa0   :  { %v111_v28 = vmax.f32 %v106_v25, 0.0 }
  0xa2   :  { %v113_v31 = vpack.c.bf16 %v111_v28, %v110_v27 }
  0xa4   :  { %165 = vmatpush.bf16.msra.mxu1 %v113_v31 }
  0xa8   :  { %166 = vmatpush.bf16.msra.mxu1 %v112_v33 }
  0xab   :  { %316 = vmatmul.msk.bf16.vlgmr.msra.gmra.mxu1 %vm152_vm1, %v332_v34 }
  0xbb   :  { %317 = vmatmul.msk.bf16.gmra.mxu1 %vm152_vm1, %v333_v37 }
 0x128   :  { %v168_v38 = vpop.f32.mrf.mxu1 }
 0x129   :  { %v169_v49 = vadd.f32 %v168_v38, %v125_v48 }
 0x12b   :  { %v178_v54 = vmax.f32 %v169_v49, 0.0 }
 0x130   :  { %v170_v39 = vpop.f32.mrf.mxu1 }
 0x131   :  { %v171_v46 = vadd.f32 %v170_v39, %v130_v42 }
 0x133   :  { %v179_v52 = vmax.f32 %v171_v46, 0.0 }
 0x135   :  { %v182_v55 = vpack.c.bf16 %v179_v52, %v178_v54 }
 0x138   :  { %v173_v41 = vpop.f32.mrf.mxu1 }
 0x139   :  { %v174_v43 = vadd.f32 %v173_v41, %v135_v40 }
 0x13b   :  { %v180_v50 = vmax.f32 %v174_v43, 0.0 }
 0x140   :  { %v175_v45 = vpop.f32.mrf.mxu1 }
 0x141   :  { %v176_v47 = vadd.f32 %v175_v45, %v140_v44 }
 0x143   :  { %v181_v51 = vmax.f32 %v176_v47, 0.0 }
 0x145   :  { %v183_v53 = vpack.c.bf16 %v181_v51, %v180_v50 }
 0x147   :  { %234 = vmatpush.bf16.msra.mxu2 %v183_v53 }
 0x14b   :  { %235 = vmatpush.bf16.msra.mxu2 %v182_v55 }
 0x14e   :  { %326 = vmatmul.msk.bf16.vlgmr.msra.gmra.mxu2 %vm152_vm1, %v334_v56 }
 0x15e   :  { %327 = vmatmul.msk.bf16.gmra.mxu2 %vm152_vm1, %v335_v57 }
 0x1d1   :  { %v237_v58 = vpop.f32.mrf.mxu2 }
 0x1d2   :  { %v238_v5 = vadd.f32 %v237_v58, %v195_v4 }
 0x1d4   :  { %v247_v10 = vmax.f32 %v238_v5, 0.0 }
 0x1d9   :  { %v239_v59 = vpop.f32.mrf.mxu2 }
 0x1da   :  { %v240_v2 = vadd.f32 %v239_v59, %v200_v0 }
 0x1dc   :  { %v248_v8 = vmax.f32 %v240_v2, 0.0 }
 0x1de   :  { %v251_v11 = vpack.c.bf16 %v248_v8, %v247_v10 }
 0x1e1   :  { %v242_v61 = vpop.f32.mrf.mxu2 }
 0x1e2   :  { %v243_v63 = vadd.f32 %v242_v61, %v205_v60 }
 0x1e4   :  { %v249_v6 = vmax.f32 %v243_v63, 0.0 }
 0x1e9   :  { %v244_v1 = vpop.f32.mrf.mxu2 }
 0x1ea   :  { %v245_v3 = vadd.f32 %v244_v1, %v210_v62 }
 0x1ec   :  { %v250_v7 = vmax.f32 %v245_v3, 0.0 }
 0x1ee   :  { %v252_v9 = vpack.c.bf16 %v250_v7, %v249_v6 }
 0x1f0   :  { %270 = vmatpush.bf16.msra.mxu3 %v252_v9 }
 0x1f4   :  { %271 = vmatpush.bf16.msra.mxu3 %v251_v11 }
 0x1f7   :  { %328 = vmatmul.msk.bf16.vlgmr.msra.gmra.mxu3 %vm152_vm1, %v253_v12 }
 0x27a   :  { %v273_v15 = vpop.f32.mrf.mxu3 }
 0x27b   :  { %v274_v16 = vadd.f32 %v273_v15, %v260_v14 }
 0x27d   :  { %277 = vst [vmem:[#allocation3] sm:$0x1] %v274_v16 }
 0x27e   :  { %288 = dma.vmem_to_hbm [thread:$0]  %s284_s21, 16, %s286_s24, [#allocation4]  }
 0x282   :  { %v275_v17 = vpop.f32.mrf.mxu3 }
 0x283   :  { %365 = dma.done.wait [#allocation4], 16  }
 0x284   :  { %366 = vsyncadd [#allocation4], 4294967280 }
 0x285   :  { %293 = vsyncpa [#allocation4], 1 }

</bundles_post_ra>
